<compile_context>
chip_gen: v6e
topology: v6e:2x2x1
jax: 0.10.0
libtpu: 0.0.40
codegen_flags: <defaults>
</compile_context>

<pallas_src>
import functools

import jax
import jax.numpy as jnp
from jax.experimental import pallas as pl
from jax.experimental.pallas import tpu as pltpu

_LANES = 128  # TPU vreg lane width


def _round_up(x, m):
    return ((x + m - 1) // m) * m


def _affine_kernel(x_ref, w_ref, b_ref, o_ref):
    # x_ref/o_ref: [tile_rows, 128] f32 in VMEM; w_ref/b_ref: [1] f32 in SMEM.
    # Pure VPU: scalar-broadcast multiply-add, no MXU round-trip, no casts.
    o_ref[...] = x_ref[...] * w_ref[0] + b_ref[0]


@functools.partial(jax.jit, static_argnames=("tile_rows",))
def linear_forward(x, weight, bias, *, tile_rows=4096):
    """y = x @ weight.T + bias for a 1->1 Linear, as a lane-dense Pallas kernel.

    x:      [N, 1] float32
    weight: [1, 1] float32 (PyTorch layout [out_features, in_features])
    bias:   [1]    float32
    returns [N, 1] float32
    """
    N, K = x.shape
    assert K == 1 and weight.shape == (1, 1) and bias.shape == (1,)
    assert N >= 1

    x = x.astype(jnp.float32)
    w = weight.reshape(1).astype(jnp.float32)
    b = bias.reshape(1).astype(jnp.float32)

    # Lane-dense [rows, 128] view of the batch. When N is a multiple of 128 the
    # reshape is a free bitcast (no pad copy, no unpad slice at the end).
    flat = x.reshape(-1)                      # [N]
    rows = pl.cdiv(N, _LANES)                 # >= 1
    padded_len = rows * _LANES
    needs_pad = padded_len != N
    if needs_pad:
        # Only pad to the next multiple of 128 (<= 127 extra elements), never to
        # a multiple of tile_rows.
        flat = jnp.pad(flat, (0, padded_len - N))
    slab = flat.reshape(rows, _LANES)

    # Tile selection:
    #   * rows <= 8: one full-array block (block dim == array dim is legal).
    #   * otherwise: big tiles (default 4096 rows == 2 MiB), but capped so the
    #     grid has >= 2 steps — with ("parallel",) semantics the row axis is
    #     what gets sharded across the two v7x TensorCores.
    if rows <= 8:
        tile_rows = rows
    else:
        tile_rows = min(tile_rows, _round_up(pl.cdiv(rows, 2), 8))

    grid = (pl.cdiv(rows, tile_rows),)        # trailing partial block is masked

    y_slab = pl.pallas_call(
        _affine_kernel,
        out_shape=jax.ShapeDtypeStruct((rows, _LANES), jnp.float32),
        grid=grid,
        in_specs=[
            pl.BlockSpec((tile_rows, _LANES), lambda i: (i, 0)),
            pl.BlockSpec(memory_space=pltpu.MemorySpace.SMEM),  # w scalar
            pl.BlockSpec(memory_space=pltpu.MemorySpace.SMEM),  # b scalar
        ],
        out_specs=pl.BlockSpec((tile_rows, _LANES), lambda i: (i, 0)),
        compiler_params=pltpu.CompilerParams(
            dimension_semantics=("parallel",)
        ),
    )(slab, w, b)

    # Undo the lane-dense view (free when no padding was required).
    y_flat = y_slab.reshape(-1)
    if needs_pad:
        y_flat = y_flat[:N]
    return y_flat.reshape(N, 1)


if __name__ == "__main__":
    key = jax.random.PRNGKey(0)
    kx, kw, kb = jax.random.split(key, 3)

    # Module: torch.nn.Linear(1, 1) -> weight [1, 1], bias [1]
    # Init mimicking PyTorch's U(-1/sqrt(fan_in), 1/sqrt(fan_in)), fan_in = 1.
    in_features, out_features = 1, 1
    bound = 1.0 / (in_features ** 0.5)
    weight = jax.random.uniform(
        kw, (out_features, in_features), jnp.float32, -bound, bound
    )
    bias = jax.random.uniform(kb, (out_features,), jnp.float32, -bound, bound)

    # Small inputs consistent with the module's forward (x is [N, 1]); cover
    # the aligned (no pad), unaligned (pad), single-block and multi-block paths.
    for N in (8, 300, 2048, 3000):
        x = jax.random.normal(jax.random.fold_in(kx, N), (N, in_features),
                              jnp.float32)
        y = jax.block_until_ready(linear_forward(x, weight, bias))

        # Reference check (== PyTorch semantics: x @ W^T + b).
        y_ref = x @ weight.T + bias
        assert y.shape == (N, out_features)
        assert jnp.allclose(y, y_ref, atol=1e-6, rtol=1e-6)

    print("KERNEL_OK")
</pallas_src>

<mosaic_0001>
module attributes {stable_mosaic.version = 11 : i64} {
  func.func @_affine_kernel(%arg0: i32, %arg1: memref<1x128xf32, #tpu.memory_space<vmem>>, %arg2: memref<1xf32, #tpu.memory_space<smem>>, %arg3: memref<1xf32, #tpu.memory_space<smem>>, %arg4: memref<1x128xf32, #tpu.memory_space<vmem>>) attributes {dimension_semantics = [#tpu.dimension_semantics<parallel>], iteration_bounds = array<i64: 1>, scalar_prefetch = 0 : i64, scratch_operands = 0 : i64, tpu.core_type = #tpu.core_type<tc>, window_params = [{transform_indices = @transform_0, window_bounds = array<i64: 1, 128>}, {transform_indices = @transform_1, window_bounds = array<i64: 1>}, {transform_indices = @transform_2, window_bounds = array<i64: 1>}, {transform_indices = @transform_3, window_bounds = array<i64: 1, 128>}]} {
    %c0 = arith.constant 0 : index
    %c0_0 = arith.constant 0 : index
    %0 = vector.load %arg1[%c0, %c0_0] : memref<1x128xf32, #tpu.memory_space<vmem>>, vector<1x128xf32>
    %c0_1 = arith.constant 0 : index
    %1 = memref.load %arg2[%c0_1] : memref<1xf32, #tpu.memory_space<smem>>
    %2 = vector.broadcast %1 : f32 to vector<1x128xf32>
    %3 = arith.mulf %0, %2 : vector<1x128xf32>
    %c0_2 = arith.constant 0 : index
    %4 = memref.load %arg3[%c0_2] : memref<1xf32, #tpu.memory_space<smem>>
    %5 = vector.broadcast %4 : f32 to vector<1x128xf32>
    %6 = arith.addf %3, %5 : vector<1x128xf32>
    %c0_3 = arith.constant 0 : index
    %c0_4 = arith.constant 0 : index
    %7 = vector.load %arg4[%c0_3, %c0_4] : memref<1x128xf32, #tpu.memory_space<vmem>>, vector<1x128xf32>
    tpu.vector_store %arg4[%c0_3, %c0_4], %6 {strides = array<i32>} : memref<1x128xf32, #tpu.memory_space<vmem>>, vector<1x128xf32>,
    return
  }
  func.func @transform_0(%arg0: i32) -> (i32, i32) {
    %c0_i32 = arith.constant 0 : i32
    %c0_i32_0 = arith.constant 0 : i32
    return %arg0, %c0_i32 : i32, i32
  }
  func.func @transform_1(%arg0: i32) -> i32 {
    %c0_i32 = arith.constant 0 : i32
    %c0_i32_0 = arith.constant 0 : i32
    return %c0_i32 : i32
  }
  func.func @transform_2(%arg0: i32) -> i32 {
    %c0_i32 = arith.constant 0 : i32
    %c0_i32_0 = arith.constant 0 : i32
    return %c0_i32 : i32
  }
  func.func @transform_3(%arg0: i32) -> (i32, i32) {
    %c0_i32 = arith.constant 0 : i32
    %c0_i32_0 = arith.constant 0 : i32
    return %arg0, %c0_i32 : i32, i32
  }
}

</mosaic_0001>

<bundles_post_ra>
// kernel: linear_forward.1
= control target key start
LH: loop header
LB: loop body
LE: loop exit
PB: predicated region body
PF: predicated region fallthrough
CT: control target
= control target key end

     0   :  { %s60_s0 = inlined_call_operand.vmem [shape: f32[1,128], index: 0, kind: input, shape index: {}]   ;;  %s61_s1 = inlined_call_operand.<no memory space> [shape: f32[1], index: 1, kind: input, shape index: {}]   ;;  %s62_s2 = inlined_call_operand.<no memory space> [shape: f32[1], index: 2, kind: input, shape index: {}]   ;;  %s63_s3 = inlined_call_operand.vmem [shape: f32[1,128], index: 3, kind: output, shape index: {}]  }
   0x1   :  { %v16_v0 = vld [vmem:[%s60_s0] sm:$0x1]  ;;  %v18_v1 = vstv %s61_s1  ;;  %v21_v2 = vstv %s62_s2 }
   0x2   :  { %v19_v3 = vmul.f32 %v18_v1, %v16_v0 }
   0x4   :  { %v22_v4 = vadd.f32 %v21_v2, %v19_v3 }
   0x6   :  { %23 = vst [vmem:[%s63_s3] sm:$0x1] %v22_v4 }

</bundles_post_ra>
